<compile_context>
chip_gen: v5e
topology: v5e:2x2
jax: 0.10.0
libtpu: 0.0.40
codegen_flags: <defaults>
</compile_context>

<pallas_src>
import functools

import jax
import jax.numpy as jnp
from jax.experimental import pallas as pl
from jax.experimental.pallas import tpu as pltpu


# ----------------------------------------------------------------------------
# Fused Pallas kernel: conv(im2col matmul) + bias + ReLU + GAP + head
# ----------------------------------------------------------------------------
def _fused_conv_pool_head_kernel(inv_hw, p_ref, wc_ref, bc_ref, wh_ref, bh_ref,
                                 o_ref, pool_ref):
    """One grid step processes TM im2col rows of one image.

    p_ref   : (1, TM, K9) bf16  im2col patch tile of image n
    wc_ref  : (K9, Cf)    bf16  conv weight   (VMEM-resident)
    bc_ref  : (1, Cf)     f32   conv bias
    wh_ref  : (Cf, D)     f32   head weight   (VMEM-resident)
    bh_ref  : (1, D)      f32   head bias
    o_ref   : (1, 1, D)   f32   per-image detector output (written on last tile)
    pool_ref: (1, Cf)     f32   running pooled-sum accumulator (VMEM scratch)
    """
    j = pl.program_id(1)

    @pl.when(j == 0)
    def _init():
        pool_ref[...] = jnp.zeros_like(pool_ref)

    # conv-as-matmul on the MXU with f32 accumulation; epilogue stays f32
    # (v5e VPU has no bf16 elementwise).
    acc = jnp.dot(p_ref[0], wc_ref[...], preferred_element_type=jnp.float32)
    feat = jnp.maximum(acc + bc_ref[...], 0.0)               # (TM, Cf) f32
    pool_ref[...] += jnp.sum(feat, axis=0, keepdims=True)    # partial GAP sum

    @pl.when(j == pl.num_programs(1) - 1)
    def _finalize():
        pooled = pool_ref[...] * inv_hw                      # (1, Cf) mean
        out = jnp.dot(pooled, wh_ref[...], preferred_element_type=jnp.float32)
        o_ref[0] = out + bh_ref[...]                         # (1, D)


def _pick_row_tile(hw):
    """Largest row tile dividing H*W that still gives >= 2 grid steps."""
    for tm in (2048, 1024, 512, 256, 128, 64, 32, 16, 8):
        if tm <= hw and hw % tm == 0 and (hw // tm) >= 2:
            return tm
    return hw


def fused_conv_pool_head(patches, w_conv, b_conv, w_head, b_head, hw):
    """patches: (N, H*W, 9*Cin) bf16 -> (N, D) f32 detector output."""
    n, hw_, k9 = patches.shape
    assert hw_ == hw
    cf = w_conv.shape[1]
    d = w_head.shape[1]
    tm = _pick_row_tile(hw)
    n_row_tiles = hw // tm

    kernel = functools.partial(_fused_conv_pool_head_kernel, 1.0 / float(hw))

    flops = 2 * n * hw * k9 * cf + 2 * n * cf * d
    bytes_accessed = (patches.size * 2 + w_conv.size * 2 + b_conv.size * 4
                      + w_head.size * 4 + b_head.size * 4 + n * d * 4)

    out = pl.pallas_call(
        kernel,
        out_shape=jax.ShapeDtypeStruct((n, 1, d), jnp.float32),
        grid=(n, n_row_tiles),
        in_specs=[
            pl.BlockSpec((1, tm, k9), lambda i, j: (i, j, 0)),   # patch tile
            pl.BlockSpec((k9, cf), lambda i, j: (0, 0)),         # conv weight
            pl.BlockSpec((1, cf), lambda i, j: (0, 0)),          # conv bias
            pl.BlockSpec((cf, d), lambda i, j: (0, 0)),          # head weight
            pl.BlockSpec((1, d), lambda i, j: (0, 0)),           # head bias
        ],
        out_specs=pl.BlockSpec((1, 1, d), lambda i, j: (i, 0, 0)),
        scratch_shapes=[pltpu.VMEM((1, cf), jnp.float32)],
        compiler_params=pltpu.CompilerParams(
            dimension_semantics=("parallel", "arbitrary"),
            vmem_limit_bytes=32 * 1024 * 1024,
        ),
        cost_estimate=pl.CostEstimate(
            flops=flops, transcendentals=0, bytes_accessed=bytes_accessed),
    )(patches, w_conv, b_conv, w_head, b_head)
    return out[:, 0, :]


# ----------------------------------------------------------------------------
# JAX-side glue (layout / patch extraction)
# ----------------------------------------------------------------------------
def _im2col_3x3_same(x_nhwc):
    """Extract 3x3 'same' patches.  (N,H,W,C) -> (N, H*W, 9*C)."""
    n, h, w, c = x_nhwc.shape
    xp = jnp.pad(x_nhwc, ((0, 0), (1, 1), (1, 1), (0, 0)))
    cols = []
    for dy in range(3):
        for dx in range(3):
            cols.append(xp[:, dy:dy + h, dx:dx + w, :])
    patches = jnp.concatenate(cols, axis=-1)                 # (N, H, W, 9*C)
    return patches.reshape(n, h * w, 9 * c)


class DeforestObjectDetectorPallas:
    """Synthetic deforestation object detector; forward pass runs in Pallas."""

    def __init__(self, in_channels=4, feat_channels=32, num_anchors=3,
                 num_classes=2, seed=0):
        self.cin = in_channels
        self.cf = feat_channels
        self.out_dim = num_anchors * (4 + num_classes)

        k = jax.random.PRNGKey(seed)
        k1, k2, k3, k4 = jax.random.split(k, 4)
        # conv weight stored as (9*Cin, Cf) for the im2col matmul
        self.w_conv = (jax.random.normal(k1, (9 * in_channels, feat_channels),
                                         jnp.float32) * 0.05)
        self.b_conv = (jax.random.normal(k2, (1, feat_channels),
                                         jnp.float32) * 0.01)
        self.w_head = (jax.random.normal(k3, (feat_channels, self.out_dim),
                                         jnp.float32) * 0.05)
        self.b_head = (jax.random.normal(k4, (1, self.out_dim),
                                         jnp.float32) * 0.01)
        # TODO(synk): with real checkpoint weights, pad Cf / out_dim to 128 for
        # lane-dense MXU output (zero-padded columns, sliced off afterwards).

    def forward(self, x_nchw):
        n, c, h, w = x_nchw.shape
        assert c == self.cin
        x_nhwc = jnp.transpose(x_nchw, (0, 2, 3, 1))          # NCHW -> NHWC
        patches = _im2col_3x3_same(x_nhwc)                    # (N, H*W, 9*Cin)
        patches = patches.astype(jnp.bfloat16)                # bf16 MXU operand
        w_conv = self.w_conv.astype(jnp.bfloat16)
        return fused_conv_pool_head(patches, w_conv, self.b_conv,
                                    self.w_head, self.b_head, h * w)

    def predict(self, image):
        # TODO(synk): box decoding / NMS of the original `.predict` is not
        # specified by the source module; raw head outputs are returned.
        return self.forward(image)

    __call__ = forward


def _reference_forward(model, x_nchw):
    """Plain-JAX reference (same bf16-rounded MXU operands, f32 math)."""
    n, c, h, w = x_nchw.shape
    x_nhwc = jnp.transpose(x_nchw, (0, 2, 3, 1))
    patches = _im2col_3x3_same(x_nhwc)
    p = patches.astype(jnp.bfloat16).astype(jnp.float32)
    wc = model.w_conv.astype(jnp.bfloat16).astype(jnp.float32)
    feat = jnp.maximum(p @ wc + model.b_conv, 0.0)            # (N, H*W, Cf)
    pooled = jnp.mean(feat, axis=1)                           # (N, Cf)
    return pooled @ model.w_head + model.b_head               # (N, D)


if __name__ == "__main__":
    key = jax.random.PRNGKey(0)
    x = jax.random.normal(key, (2, 4, 16, 16), jnp.float32)   # NCHW

    model = DeforestObjectDetectorPallas(in_channels=4, feat_channels=32,
                                         num_anchors=3, num_classes=2, seed=0)

    out = jax.block_until_ready(model(x))
    ref = _reference_forward(model, x)

    assert out.shape == (2, 3 * (4 + 2))
    assert jnp.allclose(out, ref, atol=1e-2, rtol=1e-2), (
        float(jnp.max(jnp.abs(out - ref))))

    print("KERNEL_OK")
</pallas_src>

<mosaic_0001>
module attributes {stable_mosaic.version = 11 : i64} {
  func.func @_fused_conv_pool_head_kernel(%arg0: i32, %arg1: i32, %arg2: memref<1x128x36xbf16, #tpu.memory_space<vmem>>, %arg3: memref<36x32xbf16, #tpu.memory_space<vmem>>, %arg4: memref<1x32xf32, #tpu.memory_space<vmem>>, %arg5: memref<32x18xf32, #tpu.memory_space<vmem>>, %arg6: memref<1x18xf32, #tpu.memory_space<vmem>>, %arg7: memref<1x1x18xf32, #tpu.memory_space<vmem>>, %arg8: memref<1x32xf32, #tpu.memory_space<vmem>>) attributes {dimension_semantics = [#tpu.dimension_semantics<parallel>, #tpu.dimension_semantics<arbitrary>], iteration_bounds = array<i64: 2, 2>, scalar_prefetch = 0 : i64, scratch_operands = 1 : i64, tpu.core_type = #tpu.core_type<tc>, window_params = [{transform_indices = @transform_0, window_bounds = array<i64: 1, 128, 36>}, {pipeline_mode = #tpu.pipeline_mode<synchronous>, transform_indices = @transform_1, window_bounds = array<i64: 36, 32>}, {pipeline_mode = #tpu.pipeline_mode<synchronous>, transform_indices = @transform_2, window_bounds = array<i64: 1, 32>}, {pipeline_mode = #tpu.pipeline_mode<synchronous>, transform_indices = @transform_3, window_bounds = array<i64: 32, 18>}, {pipeline_mode = #tpu.pipeline_mode<synchronous>, transform_indices = @transform_4, window_bounds = array<i64: 1, 18>}, {transform_indices = @transform_5, window_bounds = array<i64: 1, 1, 18>}]} {
    %c0_i32 = arith.constant 0 : i32
    %0 = arith.cmpi eq, %arg1, %c0_i32 : i32
    %1 = arith.extui %0 : i1 to i32
    %c0_i32_0 = arith.constant 0 : i32
    %2 = arith.cmpi ne, %1, %c0_i32_0 : i32
    scf.if %2 {
      %cst_14 = arith.constant 0.000000e+00 : f32
      %20 = vector.broadcast %cst_14 : f32 to vector<1x32xf32>
      %c0_15 = arith.constant 0 : index
      %c0_16 = arith.constant 0 : index
      %21 = vector.load %arg8[%c0_15, %c0_16] : memref<1x32xf32, #tpu.memory_space<vmem>>, vector<1x32xf32>
      tpu.vector_store %arg8[%c0_15, %c0_16], %20 {strides = array<i32>} : memref<1x32xf32, #tpu.memory_space<vmem>>, vector<1x32xf32>,
    } else {
    }
    %c0 = arith.constant 0 : index
    %c0_1 = arith.constant 0 : index
    %c0_2 = arith.constant 0 : index
    %3 = vector.load %arg2[%c0, %c0_1, %c0_2] : memref<1x128x36xbf16, #tpu.memory_space<vmem>>, vector<1x128x36xbf16>
    %4 = vector.shape_cast %3 : vector<1x128x36xbf16> to vector<128x36xbf16>
    %c0_3 = arith.constant 0 : index
    %c0_4 = arith.constant 0 : index
    %5 = vector.load %arg3[%c0_3, %c0_4] : memref<36x32xbf16, #tpu.memory_space<vmem>>, vector<36x32xbf16>
    %cst = arith.constant dense<0.000000e+00> : vector<128x32xf32>
    %6 = tpu.matmul %4, %5, %cst {dimension_numbers = #tpu.dot_dimension_numbers<[1], [0], [0], [1], [0, 0, 1, 1], [], []>} : vector<128x36xbf16>, vector<36x32xbf16>, vector<128x32xf32> -> vector<128x32xf32>
    %c0_5 = arith.constant 0 : index
    %c0_6 = arith.constant 0 : index
    %7 = vector.load %arg4[%c0_5, %c0_6] : memref<1x32xf32, #tpu.memory_space<vmem>>, vector<1x32xf32>
    %8 = vector.broadcast %7 : vector<1x32xf32> to vector<128x32xf32>
    %9 = arith.addf %6, %8 : vector<128x32xf32>
    %cst_7 = arith.constant 0.000000e+00 : f32
    %10 = vector.broadcast %cst_7 : f32 to vector<128x32xf32>
    %11 = arith.maximumf %9, %10 : vector<128x32xf32>
    %c0_8 = arith.constant 0 : index
    %c0_9 = arith.constant 0 : index
    %12 = vector.load %arg8[%c0_8, %c0_9] : memref<1x32xf32, #tpu.memory_space<vmem>>, vector<1x32xf32>
    %cst_10 = arith.constant dense<0.000000e+00> : vector<32xf32>
    %13 = vector.multi_reduction <add>, %11, %cst_10 [0] : vector<128x32xf32> to vector<32xf32>
    %14 = vector.shape_cast %13 : vector<32xf32> to vector<1x32xf32>
    %15 = arith.addf %12, %14 : vector<1x32xf32>
    %c0_11 = arith.constant 0 : index
    %c0_12 = arith.constant 0 : index
    %16 = vector.load %arg8[%c0_11, %c0_12] : memref<1x32xf32, #tpu.memory_space<vmem>>, vector<1x32xf32>
    tpu.vector_store %arg8[%c0_11, %c0_12], %15 {strides = array<i32>} : memref<1x32xf32, #tpu.memory_space<vmem>>, vector<1x32xf32>,
    %c1_i32 = arith.constant 1 : i32
    %17 = arith.cmpi eq, %arg1, %c1_i32 : i32
    %18 = arith.extui %17 : i1 to i32
    %c0_i32_13 = arith.constant 0 : i32
    %19 = arith.cmpi ne, %18, %c0_i32_13 : i32
    scf.if %19 {
      %c0_14 = arith.constant 0 : index
      %c0_15 = arith.constant 0 : index
      %20 = vector.load %arg8[%c0_14, %c0_15] : memref<1x32xf32, #tpu.memory_space<vmem>>, vector<1x32xf32>
      %cst_16 = arith.constant 3.906250e-03 : f32
      %21 = vector.broadcast %cst_16 : f32 to vector<1x32xf32>
      %22 = arith.mulf %20, %21 : vector<1x32xf32>
      %c0_17 = arith.constant 0 : index
      %c0_18 = arith.constant 0 : index
      %23 = vector.load %arg5[%c0_17, %c0_18] : memref<32x18xf32, #tpu.memory_space<vmem>>, vector<32x18xf32>
      %cst_19 = arith.constant dense<0.000000e+00> : vector<1x18xf32>
      %24 = tpu.matmul %22, %23, %cst_19 {dimension_numbers = #tpu.dot_dimension_numbers<[1], [0], [0], [1], [0, 0, 1, 1], [], []>} : vector<1x32xf32>, vector<32x18xf32>, vector<1x18xf32> -> vector<1x18xf32>
      %c0_20 = arith.constant 0 : index
      %c0_21 = arith.constant 0 : index
      %25 = vector.load %arg6[%c0_20, %c0_21] : memref<1x18xf32, #tpu.memory_space<vmem>>, vector<1x18xf32>
      %26 = arith.addf %24, %25 : vector<1x18xf32>
      %c0_22 = arith.constant 0 : index
      %c0_23 = arith.constant 0 : index
      %c0_24 = arith.constant 0 : index
      %27 = vector.load %arg7[%c0_22, %c0_23, %c0_24] : memref<1x1x18xf32, #tpu.memory_space<vmem>>, vector<1x1x18xf32>
      %28 = vector.shape_cast %27 : vector<1x1x18xf32> to vector<1x18xf32>
      %29 = vector.shape_cast %26 : vector<1x18xf32> to vector<1x1x18xf32>
      tpu.vector_store %arg7[%c0_22, %c0_23, %c0_24], %29 {strides = array<i32>} : memref<1x1x18xf32, #tpu.memory_space<vmem>>, vector<1x1x18xf32>,
    } else {
    }
    return
  }
  func.func @transform_0(%arg0: i32, %arg1: i32) -> (i32, i32, i32) {
    %c0_i32 = arith.constant 0 : i32
    %c0_i32_0 = arith.constant 0 : i32
    return %arg0, %arg1, %c0_i32 : i32, i32, i32
  }
  func.func @transform_1(%arg0: i32, %arg1: i32) -> (i32, i32) {
    %c0_i32 = arith.constant 0 : i32
    %c0_i32_0 = arith.constant 0 : i32
    %c0_i32_1 = arith.constant 0 : i32
    return %c0_i32, %c0_i32_0 : i32, i32
  }
  func.func @transform_2(%arg0: i32, %arg1: i32) -> (i32, i32) {
    %c0_i32 = arith.constant 0 : i32
    %c0_i32_0 = arith.constant 0 : i32
    %c0_i32_1 = arith.constant 0 : i32
    return %c0_i32, %c0_i32_0 : i32, i32
  }
  func.func @transform_3(%arg0: i32, %arg1: i32) -> (i32, i32) {
    %c0_i32 = arith.constant 0 : i32
    %c0_i32_0 = arith.constant 0 : i32
    %c0_i32_1 = arith.constant 0 : i32
    return %c0_i32, %c0_i32_0 : i32, i32
  }
  func.func @transform_4(%arg0: i32, %arg1: i32) -> (i32, i32) {
    %c0_i32 = arith.constant 0 : i32
    %c0_i32_0 = arith.constant 0 : i32
    %c0_i32_1 = arith.constant 0 : i32
    return %c0_i32, %c0_i32_0 : i32, i32
  }
  func.func @transform_5(%arg0: i32, %arg1: i32) -> (i32, i32, i32) {
    %c0_i32 = arith.constant 0 : i32
    %c0_i32_0 = arith.constant 0 : i32
    %c0_i32_1 = arith.constant 0 : i32
    return %arg0, %c0_i32, %c0_i32_0 : i32, i32, i32
  }
}

</mosaic_0001>

<bundles_post_ra>
// kernel: tpu_custom_call.1
= control target key start
LH: loop header
LB: loop body
LE: loop exit
PB: predicated region body
PF: predicated region fallthrough
CT: control target
= control target key end

     0   :  { %10 = vsyncpa [#allocation4], 0  ;;  %s1082_s0 = inlined_call_operand.vmem [shape: bf16[2,256,36], index: 0, kind: input, shape index: {}]   ;;  %s1083_s1 = inlined_call_operand.vmem [shape: bf16[36,32], index: 1, kind: input, shape index: {}]   ;;  %s1084_s2 = inlined_call_operand.vmem [shape: f32[1,32], index: 2, kind: input, shape index: {}]   ;;  %s1085_s3 = inlined_call_operand.vmem [shape: f32[32,18], index: 3, kind: input, shape index: {}]   ;;  %s1086_s4 = inlined_call_operand.vmem [shape: f32[1,18], index: 4, kind: input, shape index: {}]   ;;  %s1087_s5 = inlined_call_operand.hbm [shape: f32[2,1,18], index: 5, kind: output, shape index: {}]  }
   0x1   :  { %12 = vsyncpa [#allocation4 + $0x1], 0  ;;  %s874_s18 = smov 0   ;;  %s876_s19 = smov 0  }
   0x2   :  { %s878_s20 = smov 0   ;;  %s880_s21 = smov 0  }
   0x3   :  { %s882_s22 = smov 0   ;;  %s884_s23 = smov 0  }
   0x4   :  { %s886_s24 = smov 0   ;;  %s888_s25 = smov 0  }
   0x5 LB: > { %s594_s26 = sadd.s32 4294967295, %s841_s25   ;;  %s595_s27 = sadd.s32 4294967294, %s841_s25   ;;  %s841_s25 = sphi %s888_s25, %s18_s25   ;;  %s837_s24 = sphi %s886_s24, %s1096_s24   ;;  %s833_s23 = sphi %s884_s23, %s1095_s23   ;;  %s829_s22 = sphi %s882_s22, %s1094_s22   ;;  %s825_s21 = sphi %s880_s21, %s1093_s21   ;;  %s821_s20 = sphi %s878_s20, %s1092_s20   ;;  %s817_s19 = sphi %s876_s19, %s1091_s19   ;;  %s813_s18 = sphi %s874_s18, %s1090_s18  }
   0x6   : > { %s27_s28 = sadd.s32 1, %s833_s23  ;;  %s30_s29 = sadd.s32 1, %s837_s24 }
   0x7   : > { %p28_p0 = scmp.ge.s32.totalorder %s27_s28, 2  ;;  %p159_p1 = scmp.ne.s32.totalorder %s821_s20, %s817_s19 }
   0x8   : > { %p160_p2 = scmp.eq.s32.totalorder %s594_s26, 3  ;;  %p165_p4 = scmp.ne.s32.totalorder %s817_s19, %s813_s18 }
   0x9   : > { %s1098_s28 = smov (%p28_p0, %s27_s28), 0  ;;  %s1100_s29 = smov (!%p28_p0, %s30_s29), %s837_s24 }
   0xa   : > { %p923_p3 = por %p160_p2, %p159_p1  ;;  %p32_p5 = scmp.ge.s32.totalorder %s1100_s29, 2 }
   0xb   : > { %p166_p6 = scmp.eq.s32.totalorder %s595_s27, 3  ;;  %p598_p7 = scmp.ge.s32.totalorder %s841_s25, 1 }
   0xc   : > { %p209_p8 = scmp.lt.s32.totalorder %s841_s25, 5  ;;  %s1102_s29 = smov (%p32_p5, %s1100_s29), 0 }
   0xd   : > { %p933_p9 = por %p166_p6, %p165_p4  ;;  %s146_s7 = ssub.s32 %s837_s24, %s1102_s29 }
   0xe   : > { %p210_p10 = pnand %p598_p7, %p209_p8  ;;  %s149_s8 = sadd.s32 1, %s821_s20 }
   0xf   : > { %p147_p11 = scmp.eq.s32.totalorder %s146_s7, 0  ;;  %s238_s10 = sand.u32 (!%p210_p10), 1, %s817_s19  }
  0x10   : > { %213 = sbr.rel (%p210_p10) target bundleno = 394 (0x18a), region = 40  ;;  %s599_s11 = sshll.u32 (!%p210_p10), %s825_s21, 4 }
  0x11   : > { %s941_s9 = scalar_select %p147_p11, %s821_s20, %s149_s8  }
  0x12   : > { %p241_p12 = scmp.lt.s32.totalorder (!%p210_p10), %s829_s22, 1  ;;  %p243_p13 = scmp.lt.s32.totalorder (!%p210_p10), %s599_s11, 31 }
  0x13   : > { %s954_s27 = scalar_lea.vmem (!%p210_p10), [#allocation3], %s238_s10  ;;  %p602_p0 = scmp.ne.s32.totalorder (!%p210_p10), %s825_s21, 0 }
  0x15   : > { %s242_s12 = scalar_select %p241_p12, %s829_s22, 1 }
  0x16   : > { %s1104_s11 = smov (!%p243_p13, %s599_s11), 31  ;;  %254 = sbr.rel (%p602_p0) target bundleno = 29 (0x1d), region = 44 }
  0x17   : > { %s600_s13 = sshll.u32 %s242_s12, 5 }
  0x18   : > { %s246_s14 = sadd.s32 %s600_s13, %s1104_s11 }
  0x19   : > { %s601_s15 = sshll.u32 %s246_s14, 2 }
  0x1a   : > { %s950_s26 = scalar_lea.vmem %s1082_s0, %s601_s15 }
  0x1b   : > { %vm255_vm0 = vcmask 253952   ;;  %v843_v0 = vmov 0.0  }
  0x1c   : > { %256 = vst.msk [vmem:[#allocation2] sm:$0x1] %vm255_vm0, %v843_v0 }
  0x1d PF: > { %v277_v1 = vld [vmem:[%s1083_s1 + $0x10] sm:$0x3]  ;;  %vm362_vm1 = vcmask 1041408   ;;  %v664_v5 = vld [vmem:[%s1083_s1 + $0x8] sm:$0xff]  ;;  %v663_v6 = vld [vmem:[%s1083_s1] sm:$0xff]  ;;  %vm337_vm2 = vcmask 293888  }
  0x1e   : > { %v331_v2 = vunpack.c.l.b16 %v277_v1  ;;  %v655_v7 = vld [vmem:[%s950_s26] sm:$0xff]  ;;  %v657_v8 = vld [vmem:[%s950_s26 + $0x10] sm:$0xff]  ;;  %v656_v11 = vld [vmem:[%s950_s26 + $0x8] sm:$0xff]  ;;  %vm432_vm3 = vcmask 261120   ;;  %vm471_vm4 = vcmask 253952   ;;  %p651_p1 = scmp.ne.s32.totalorder %s825_s21, 1 }
  0x1f   : > { %v659_v9 = vld [vmem:[%s950_s26 + $0x20] sm:$0xff]  ;;  %v661_v10 = vld [vmem:[%s950_s26 + $0x30] sm:$0xff]  ;;  %v658_v12 = vld [vmem:[%s950_s26 + $0x18] sm:$0xff] }
  0x20   : > { %v334_v3 = vpack.c.b16 %v331_v2, %v331_v2  ;;  %v660_v13 = vld [vmem:[%s950_s26 + $0x28] sm:$0xff]  ;;  %v662_v14 = vld [vmem:[%s950_s26 + $0x38] sm:$0xff]  ;;  %v985_v21 = vld [vmem:[%s1084_s2] ss:$0 sm:$0xff] }
  0x22   : > { %v364_v4 = vsel %vm362_vm1, %v334_v3, 0 }
  0x23   : > { %371 = vmatpush.bf16.msra.mxu0 %v364_v4  ;;  %665 = vmatpush.bf16.msra.mxu1 %v364_v4 }
  0x24   : > { %666 = vmatpush.bf16.msra.mxu2 %v364_v4  ;;  %667 = vmatpush.bf16.msra.mxu3 %v364_v4 }
  0x27   : > { %372 = vmatpush.bf16.msra.mxu0 %v664_v5  ;;  %668 = vmatpush.bf16.msra.mxu1 %v664_v5 }
  0x28   : > { %669 = vmatpush.bf16.msra.mxu2 %v664_v5  ;;  %670 = vmatpush.bf16.msra.mxu3 %v664_v5 }
  0x2b   : > { %373 = vmatpush.bf16.msra.mxu0 %v663_v6  ;;  %671 = vmatpush.bf16.msra.mxu1 %v663_v6 }
  0x2c   : > { %672 = vmatpush.bf16.msra.mxu2 %v663_v6  ;;  %673 = vmatpush.bf16.msra.mxu3 %v663_v6 }
  0x2e   : > { %643 = vmatmul.msk.bf16.vlgmr.msra.gmra.mxu0 %vm337_vm2, %v655_v7  ;;  %645 = vmatmul.msk.bf16.vlgmr.msra.gmra.mxu1 %vm337_vm2, %v657_v8 }
  0x2f   : > { %647 = vmatmul.msk.bf16.vlgmr.msra.gmra.mxu2 %vm337_vm2, %v659_v9  ;;  %649 = vmatmul.msk.bf16.vlgmr.msra.gmra.mxu3 %vm337_vm2, %v661_v10 }
  0x3e   : > { %644 = vmatmul.msk.bf16.gmra.mxu0 %vm337_vm2, %v656_v11  ;;  %646 = vmatmul.msk.bf16.gmra.mxu1 %vm337_vm2, %v658_v12 }
  0x3f   : > { %648 = vmatmul.msk.bf16.gmra.mxu2 %vm337_vm2, %v660_v13  ;;  %650 = vmatmul.msk.bf16.gmra.mxu3 %vm337_vm2, %v662_v14 }
  0xab   : > { %v375_v15 = vpop.f32.mrf.mxu0  ;;  %v385_v16 = vpop.f32.mrf.mxu1 }
  0xac   : > { %v376_v26 = vadd.f32 %v985_v21, %v375_v15  ;;  %v386_v32 = vadd.f32 %v985_v21, %v385_v16 }
  0xae   : > { %v415_v29 = vmax.f32 %v376_v26, 0.0  ;;  %v419_v42 = vmax.f32 %v386_v32, 0.0 }
  0xb0   : > { %v433_v36 = vsel %vm432_vm3, %v415_v29, 0.0  ;;  %v440_v50 = vsel %vm432_vm3, %v419_v42, 0.0 }
  0xb2   : > { %v395_v17 = vpop.f32.mrf.mxu2  ;;  %v405_v20 = vpop.f32.mrf.mxu3 }
  0xb3   : > { %v377_v18 = vpop.f32.mrf.mxu0  ;;  %v387_v19 = vpop.f32.mrf.mxu1  ;;  %v396_v51 = vadd.f32 %v985_v21, %v395_v17  ;;  %v406_v5 = vadd.f32 %v985_v21, %v405_v20 }
  0xb4   : > { %v378_v22 = vadd.f32 %v985_v21, %v377_v18  ;;  %v388_v37 = vadd.f32 %v985_v21, %v387_v19 }
  0xb5   : > { %v423_v60 = vmax.f32 %v396_v51, 0.0  ;;  %v427_v13 = vmax.f32 %v406_v5, 0.0 }
  0xb6   : > { %v416_v28 = vmax.f32 %v378_v22, 0.0  ;;  %v420_v46 = vmax.f32 %v388_v37, 0.0 }
  0xb7   : > { %v448_v4 = vsel %vm432_vm3, %v423_v60, 0.0  ;;  %v456_v22 = vsel %vm432_vm3, %v427_v13, 0.0 }
  0xb8   : > { %v434_v33 = vsel %vm432_vm3, %v416_v28, 0.0  ;;  %v442_v55 = vsel %vm432_vm3, %v420_v46, 0.0 }
  0xb9   : > { %v435_v40 = vadd.f32 %v434_v33, %v433_v36  ;;  %v431_v36 = vld [vmem:[#allocation2] sm:$0x1] }
  0xba   : > { %v397_v23 = vpop.f32.mrf.mxu2  ;;  %v407_v31 = vpop.f32.mrf.mxu3 }
  0xbb   : > { %v380_v24 = vpop.f32.mrf.mxu0  ;;  %v390_v25 = vpop.f32.mrf.mxu1  ;;  %v398_v56 = vadd.f32 %v985_v21, %v397_v23  ;;  %v408_v9 = vadd.f32 %v985_v21, %v407_v31 }
  0xbc   : > { %v381_v27 = vadd.f32 %v985_v21, %v380_v24  ;;  %v391_v43 = vadd.f32 %v985_v21, %v390_v25 }
  0xbd   : > { %v424_v0 = vmax.f32 %v398_v56, 0.0  ;;  %v428_v17 = vmax.f32 %v408_v9, 0.0 }
  0xbe   : > { %v417_v30 = vmax.f32 %v381_v27, 0.0  ;;  %v421_v52 = vmax.f32 %v391_v43, 0.0 }
  0xbf   : > { %v450_v8 = vsel %vm432_vm3, %v424_v0, 0.0  ;;  %v458_v25 = vsel %vm432_vm3, %v428_v17, 0.0 }
  0xc0   : > { %v436_v38 = vsel %vm432_vm3, %v417_v30, 0.0  ;;  %v444_v61 = vsel %vm432_vm3, %v421_v52, 0.0 }
  0xc1   : > { %v437_v45 = vadd.f32 %v436_v38, %v435_v40 }
  0xc2   : > { %v400_v35 = vpop.f32.mrf.mxu2  ;;  %v410_v54 = vpop.f32.mrf.mxu3 }
  0xc3   : > { %v382_v34 = vpop.f32.mrf.mxu0  ;;  %v392_v41 = vpop.f32.mrf.mxu1  ;;  %v401_v62 = vadd.f32 %v985_v21, %v400_v35  ;;  %v411_v15 = vadd.f32 %v985_v21, %v410_v54 }
  0xc4   : > { %v383_v39 = vadd.f32 %v985_v21, %v382_v34  ;;  %v393_v48 = vadd.f32 %v985_v21, %v392_v41 }
  0xc5   : > { %v425_v6 = vmax.f32 %v401_v62, 0.0  ;;  %v429_v23 = vmax.f32 %v411_v15, 0.0 }
  0xc6   : > { %v418_v44 = vmax.f32 %v383_v39, 0.0  ;;  %v422_v57 = vmax.f32 %v393_v48, 0.0 }
  0xc7   : > { %v452_v14 = vsel %vm432_vm3, %v425_v6, 0.0  ;;  %v460_v28 = vsel %vm432_vm3, %v429_v23, 0.0 }
  0xc8   : > { %v438_v47 = vsel %vm432_vm3, %v418_v44, 0.0  ;;  %v446_v1 = vsel %vm432_vm3, %v422_v57, 0.0 }
  0xc9   : > { %v439_v49 = vadd.f32 %v438_v47, %v437_v45 }
  0xca   : > { %v402_v59 = vpop.f32.mrf.mxu2  ;;  %v412_v12 = vpop.f32.mrf.mxu3 }
  0xcb   : > { %v441_v53 = vadd.f32 %v440_v50, %v439_v49  ;;  %v403_v2 = vadd.f32 %v985_v21, %v402_v59  ;;  %v413_v19 = vadd.f32 %v985_v21, %v412_v12 }
  0xcd   : > { %v443_v58 = vadd.f32 %v442_v55, %v441_v53  ;;  %v426_v10 = vmax.f32 %v403_v2, 0.0  ;;  %v430_v26 = vmax.f32 %v413_v19, 0.0 }
  0xcf   : > { %v445_v63 = vadd.f32 %v444_v61, %v443_v58  ;;  %v454_v18 = vsel %vm432_vm3, %v426_v10, 0.0  ;;  %v462_v30 = vsel %vm432_vm3, %v430_v26, 0.0 }
  0xd1   : > { %v447_v3 = vadd.f32 %v446_v1, %v445_v63 }
  0xd3   : > { %v449_v7 = vadd.f32 %v448_v4, %v447_v3 }
  0xd5   : > { %v451_v11 = vadd.f32 %v450_v8, %v449_v7 }
  0xd7   : > { %v453_v16 = vadd.f32 %v452_v14, %v451_v11 }
  0xd9   : > { %v455_v20 = vadd.f32 %v454_v18, %v453_v16 }
  0xdb   : > { %v457_v24 = vadd.f32 %v456_v22, %v455_v20 }
  0xdd   : > { %v459_v27 = vadd.f32 %v458_v25, %v457_v24 }
  0xdf   : > { %v461_v29 = vadd.f32 %v460_v28, %v459_v27 }
  0xe1   : > { %v463_v31 = vadd.f32 %v462_v30, %v461_v29 }
  0xe3   : > { %v464_v32 = vrot.slane %v463_v31, 4 }
  0xe5   : > { %v465_v33 = vadd.f32 %v464_v32, %v463_v31 }
  0xe7   : > { %v466_v34 = vrot.slane %v465_v33, 2 }
  0xe9   : > { %v467_v35 = vadd.f32 %v466_v34, %v465_v33 }
  0xeb   : > { %v468_v21 = vrot.slane %v467_v35, 1 }
  0xed   : > { %v469_v37 = vadd.f32 %v468_v21, %v467_v35  ;;  %476 = sbr.rel (%p651_p1) target bundleno = 380 (0x17c), region = 48 }
  0xef   : > { %v470_v38 = vadd.f32 %v469_v37, %v431_v36 }
  0xf1   : > { %472 = vst.msk [vmem:[#allocation2] sm:$0x1] %vm471_vm4, %v470_v38 }
  0xf2   : > { %v482_v39 = vld [vmem:[%s1085_s3 + $0x18] sm:$0xff]  ;;  %v481_v40 = vld [vmem:[%s1085_s3 + $0x10] sm:$0xff]  ;;  %v480_v42 = vld [vmem:[%s1085_s3 + $0x8] sm:$0xff]  ;;  %vm507_vm5 = vcmask 139264  }
  0xf3   : > { %499 = vmatpush.msra.mxu0 %v482_v39  ;;  %v479_v43 = vld [vmem:[%s1085_s3] sm:$0xff] }
  0xf4   : > { %v483_v45 = vld [vmem:[%s1086_s4] sm:$0x1] }
  0xf5   : > { %500 = vmatpush.msra.mxu0 %v481_v40 }
  0xf7   : > { %501 = vmatpush.msra.mxu0 %v480_v42 }
  0xf8   : > { %v477_v41 = vld [vmem:[#allocation2] sm:$0x1] }
  0xf9   : > { %v478_v44 = vmul.f32 0.00390625, %v477_v41  ;;  %502 = vmatpush.msra.mxu0 %v479_v43 }
  0xfb   : > { %652 = vmatmul.msk.f32.vlgmr.msra.gmra.mxu0 %vm432_vm3, %v478_v44 }
 0x178   : > { %v504_v46 = vpop.f32.mrf.mxu0 }
 0x179   : > { %v505_v47 = vadd.f32 %v504_v46, %v483_v45 }
 0x17b   : > { %508 = vst.msk [vmem:[%s954_s27] sm:$0x1] %vm507_vm5, %v505_v47 }
 0x17c PF: > { %s518_s26 = scalar_lea.hbm %s1087_s5, %s829_s22  ;;  %s520_s7 = sshll.u32 %s954_s27, 4  ;;  %s521_s7 = int_to_ptr.vmem [resolvable:$true] %s520_s7 }
 0x17d   : > { %s522_s8 = sshll.u32 %s518_s26, 4  ;;  %s510_s11 = scalar_lea.sflag [#allocation4], %s238_s10  ;;  %s523_s8 = int_to_ptr.hbm [resolvable:$true] %s522_s8 }
 0x17e   : > { %s761_s12 = sshra.s32 %s523_s8, 4  ;;  %s767_s15 = scalar_lea.hbm %s1087_s5, 2  ;;  %s762_s12 = int_to_ptr.hbm [resolvable:$true] %s761_s12 }
 0x17f   : > { %s763_s13 = scalar_lea.hbm %s762_s12, 1  ;;  %p768_p6 = scmp.lt.s32.totalorder %s762_s12, %s1087_s5 }
 0x180   : > { %p764_p2 = scmp.ne.s32.totalorder %s762_s12, %s763_s13  ;;  %p769_p7 = scmp.lt.s32.totalorder %s767_s15, %s763_s13 }
 0x182   : > { %p765_p4 = pnand %p764_p2, %p923_p3  ;;  %p770_p8 = por %p769_p7, %p768_p6 }
 0x184   : > { %p766_p5 = pneg %p765_p4 }
 0x186   : > { %p771_p10 = pnand %p770_p8, %p766_p5 }
 0x188   : > { %774 = shalt.err (!%p771_p10)
}
 0x189   : > { %674 = dma.vmem_to_hbm [thread:$0]  (%p923_p3), %s521_s7, 16, %s523_s8, %s510_s11  }
 0x18a PF: > { %p680_p11 = scmp.ge.s32.totalorder %s841_s25, 2  ;;  %s534_s22 = sand.u32 1, %s813_s18  }
 0x18b   : > { %s535_s10 = scalar_lea.sflag [#allocation4], %s534_s22 }
 0x18c   : > { %p677_p12 = pnand %p680_p11, %p933_p9 }
 0x18e   : > { %p678_p13 = pneg %p677_p12 }
 0x190   : > { %808 = dma.done.wait (%p678_p13), %s535_s10, 16  }
 0x191   : > { %810 = vsyncadd (%p678_p13), %s535_s10, 4294967280  ;;  %s18_s25 = sadd.s32 1, %s841_s25   ;;  %s1090_s18 = smov %s817_s19 }
 0x192   : > { %p15_p0 = scmp.ge.s32.totalorder %s18_s25, 6   ;;  %s1091_s19 = smov %s821_s20 }
 0x193   : > { %s1092_s20 = smov %s941_s9  ;;  %s1093_s21 = smov %s833_s23 }
 0x194   : > { %s1094_s22 = smov %s837_s24  ;;  %s1095_s23 = smov %s1098_s28 }
 0x195   : > { %s1096_s24 = smov %s1102_s29  ;;  %17 = sbr.rel (!%p15_p0) target bundleno = 5 (0x5), region = 83 }
 0x19a   :  { %540 = vsyncpa [#allocation4], 1 }
 0x19b   :  { %542 = vsyncpa [#allocation4 + $0x1], 1 }

</bundles_post_ra>
